<compile_context>
chip_gen: v5e
topology: v5e:2x2
jax: 0.10.0
libtpu: 0.0.40
codegen_flags: <defaults>
</compile_context>

<pallas_src>
import functools

import jax
import jax.numpy as jnp
from jax import lax
from jax.experimental import pallas as pl
from jax.experimental.pallas import tpu as pltpu

MAX_TILE_M = 1024  # im2col rows per grid step; ~0.5 MiB/block, fits every gen


def _round_up(x, m):
    return ((x + m - 1) // m) * m


# -----------------------------------------------------------------------------
# Pallas kernels
# -----------------------------------------------------------------------------
def _conv_mm_kernel(p_ref, w_ref, b_ref, o_ref):
    """One M-tile of relu(W @ patches^T + b), lane-dense output.

    p_ref: (TILE_M, K_pad) bf16  im2col patches tile
    w_ref: (O_pad, K_pad)  bf16  flattened conv weight (resident across grid)
    b_ref: (O_pad, 1)      f32   bias
    o_ref: (O_pad, TILE_M) f32   output tile (channels on sublanes)
    """
    acc = lax.dot_general(
        w_ref[...], p_ref[...],
        dimension_numbers=(((1,), (1,)), ((), ())),  # contract K with K
        preferred_element_type=jnp.float32)
    o_ref[...] = jnp.maximum(acc + b_ref[...], 0.0)


def conv_matmul_relu(patches, w, b, tile_m):
    """patches: (Mp, K_pad) bf16, w: (O_pad, K_pad) bf16, b: (O_pad, 1) f32
    -> (O_pad, Mp) f32.  Mp % tile_m == 0, so every block is full/aligned."""
    Mp, K_pad = patches.shape
    O_pad = w.shape[0]
    grid = (Mp // tile_m,)
    return pl.pallas_call(
        _conv_mm_kernel,
        out_shape=jax.ShapeDtypeStruct((O_pad, Mp), jnp.float32),
        grid=grid,
        in_specs=[
            pl.BlockSpec((tile_m, K_pad), lambda i: (i, 0)),
            pl.BlockSpec((O_pad, K_pad), lambda i: (0, 0)),
            pl.BlockSpec((O_pad, 1), lambda i: (0, 0)),
        ],
        out_specs=pl.BlockSpec((O_pad, tile_m), lambda i: (0, i)),
        compiler_params=pltpu.CompilerParams(
            dimension_semantics=("parallel",)),
        cost_estimate=pl.CostEstimate(
            flops=2 * Mp * K_pad * O_pad,
            transcendentals=0,
            bytes_accessed=Mp * K_pad * 2 + O_pad * K_pad * 2 + O_pad * Mp * 4),
    )(patches, w, b)


def _fc_tail_kernel(x_ref, w1_ref, b1_ref, w2_ref, b2_ref, w3_ref, b3_ref,
                    o_ref, *, n_valid, eps):
    """Fused BatchNorm1d(affine=False, batch stats) + fc1/ReLU + fc2/ReLU + fc3.

    x_ref : (Np, 512) f32  flattened features, zero-padded rows/cols
    w*_ref: bf16 weights, b*_ref: f32 biases, pre-padded to 128-aligned shapes
    o_ref : (Np, 128) f32  padded logits (first 10 columns are real)
    """
    x = x_ref[...]
    rows = lax.broadcasted_iota(jnp.int32, (x.shape[0], 1), 0)
    valid = rows < n_valid
    inv_n = 1.0 / n_valid
    # Padded rows are exactly zero (constructed in glue), so sum/n is the mean.
    mean = jnp.sum(x, axis=0, keepdims=True) * inv_n
    cen = jnp.where(valid, x - mean, 0.0)
    var = jnp.sum(cen * cen, axis=0, keepdims=True) * inv_n  # biased, as PyTorch
    xn = cen * lax.rsqrt(var + eps)
    # TODO(synk): self.S2SB_p = projections.PerturbationsNet(
    #   method=projections.LP_Stage2_SchemeB_perturbed) -- declarative LP
    #   projection layer whose source is unavailable; passed through as identity.
    h = jnp.dot(xn.astype(jnp.bfloat16), w1_ref[...],
                preferred_element_type=jnp.float32)
    h = jnp.maximum(h + b1_ref[...], 0.0)
    h = jnp.dot(h.astype(jnp.bfloat16), w2_ref[...],
                preferred_element_type=jnp.float32)
    h = jnp.maximum(h + b2_ref[...], 0.0)
    h = jnp.dot(h.astype(jnp.bfloat16), w3_ref[...],
                preferred_element_type=jnp.float32)
    o_ref[...] = h + b3_ref[...]


def fc_tail(flat, q, eps=1e-5):
    """flat: (N, 400) f32 -> logits (N, 10) f32 via one VMEM-resident kernel."""
    N, F = flat.shape
    Np = max(8, _round_up(N, 8))
    Fp = q["fc1_w"].shape[0]                      # 512
    n_out_pad = q["fc3_w"].shape[1]               # 128
    x_p = jnp.zeros((Np, Fp), jnp.float32).at[:N, :F].set(flat)
    operands = [x_p, q["fc1_w"], q["fc1_b"], q["fc2_w"], q["fc2_b"],
                q["fc3_w"], q["fc3_b"]]
    out = pl.pallas_call(
        functools.partial(_fc_tail_kernel, n_valid=N, eps=eps),
        out_shape=jax.ShapeDtypeStruct((Np, n_out_pad), jnp.float32),
        grid=(1,),
        in_specs=[pl.BlockSpec(op.shape, lambda i: (0, 0)) for op in operands],
        out_specs=pl.BlockSpec((Np, n_out_pad), lambda i: (0, 0)),
        compiler_params=pltpu.CompilerParams(
            dimension_semantics=("arbitrary",)),
    )(*operands)
    return out[:N, :10]


# -----------------------------------------------------------------------------
# Glue (patch extraction, pooling, layer wiring)
# -----------------------------------------------------------------------------
def _conv_stage(x_nhwc, w, b, out_ch, ksize):
    """x_nhwc: (N,H,W,C) bf16 -> relu(valid conv) as (out_ch, N, OH, OW) f32."""
    N, H, W, C = x_nhwc.shape
    OH, OW = H - ksize + 1, W - ksize + 1
    K = C * ksize * ksize
    K_pad = w.shape[1]
    M = N * OH * OW
    tile_m = min(MAX_TILE_M, _round_up(M, 128))
    Mp = _round_up(M, tile_m)
    # One fused XLA op; output feature ordering is (C, kh, kw), which matches
    # the flattened PyTorch conv weight layout.
    patches = lax.conv_general_dilated_patches(
        x_nhwc, filter_shape=(ksize, ksize), window_strides=(1, 1),
        padding="VALID", dimension_numbers=("NHWC", "HWIO", "NHWC"))
    patches = patches.reshape(M, K)
    if Mp != M or K_pad != K:
        # Single small pad (rows to the tile multiple, cols to aligned K) so
        # every Pallas block is full, aligned and unmasked.
        patches = jnp.pad(patches, ((0, Mp - M), (0, K_pad - K)))
    out = conv_matmul_relu(patches, w, b, tile_m)          # (O_pad, Mp) f32
    return out[:out_ch, :M].reshape(out_ch, N, OH, OW)


def maxpool2x2_cnhw(x):
    C, N, H, W = x.shape
    return jnp.max(x.reshape(C, N, H // 2, 2, W // 2, 2), axis=(3, 5))


# -----------------------------------------------------------------------------
# Parameters
# -----------------------------------------------------------------------------
def init_params(key):
    """Deterministic PyTorch-style init: U(-1/sqrt(fan_in), 1/sqrt(fan_in))."""
    def uinit(k, shape, fan_in):
        bound = 1.0 / jnp.sqrt(float(fan_in))
        return jax.random.uniform(k, shape, jnp.float32, -bound, bound)

    ks = jax.random.split(key, 10)
    p = {}
    p["conv1_w"] = uinit(ks[0], (6, 3, 5, 5), 3 * 5 * 5)
    p["conv1_b"] = uinit(ks[1], (6,), 3 * 5 * 5)
    p["conv2_w"] = uinit(ks[2], (16, 6, 5, 5), 6 * 5 * 5)
    p["conv2_b"] = uinit(ks[3], (16,), 6 * 5 * 5)
    p["fc1_w"] = uinit(ks[4], (120, 400), 400)
    p["fc1_b"] = uinit(ks[5], (120,), 400)
    p["fc2_w"] = uinit(ks[6], (84, 120), 120)
    p["fc2_b"] = uinit(ks[7], (84,), 120)
    p["fc3_w"] = uinit(ks[8], (10, 84), 84)
    p["fc3_b"] = uinit(ks[9], (10,), 84)
    return p


def prepare_params(p):
    """One-time, kernel-ready weight prep: reshape/transpose/pad/bf16-cast."""
    def prep_conv(w, b, o_pad, k_pad):
        O, C, kh, kw = w.shape
        K = C * kh * kw
        wm = jnp.zeros((o_pad, k_pad), jnp.bfloat16)
        wm = wm.at[:O, :K].set(w.reshape(O, K).astype(jnp.bfloat16))
        bm = jnp.zeros((o_pad, 1), jnp.float32).at[:O, 0].set(b)
        return wm, bm

    def prep_fc(w, b, k_pad, n_pad):
        out_f, in_f = w.shape
        wm = jnp.zeros((k_pad, n_pad), jnp.bfloat16)
        wm = wm.at[:in_f, :out_f].set(w.T.astype(jnp.bfloat16))
        bm = jnp.zeros((1, n_pad), jnp.float32).at[0, :out_f].set(b)
        return wm, bm

    q = {}
    q["c1_w"], q["c1_b"] = prep_conv(p["conv1_w"], p["conv1_b"], 8, 128)
    q["c2_w"], q["c2_b"] = prep_conv(p["conv2_w"], p["conv2_b"], 16, 256)
    q["fc1_w"], q["fc1_b"] = prep_fc(p["fc1_w"], p["fc1_b"], 512, 128)
    q["fc2_w"], q["fc2_b"] = prep_fc(p["fc2_w"], p["fc2_b"], 128, 128)
    q["fc3_w"], q["fc3_b"] = prep_fc(p["fc3_w"], p["fc3_b"], 128, 128)
    return q


# -----------------------------------------------------------------------------
# Forward pass
# -----------------------------------------------------------------------------
def net_forward(q, x):
    # x: (N, 3, 32, 32) f32, NCHW (PyTorch layout)
    N = x.shape[0]
    xb = x.astype(jnp.bfloat16).transpose(0, 2, 3, 1)        # (N,32,32,3) NHWC
    y = _conv_stage(xb, q["c1_w"], q["c1_b"], 6, 5)          # (6,N,28,28) f32
    y = maxpool2x2_cnhw(y)                                   # (6,N,14,14)
    xb = y.astype(jnp.bfloat16).transpose(1, 2, 3, 0)        # (N,14,14,6) NHWC
    y = _conv_stage(xb, q["c2_w"], q["c2_b"], 16, 5)         # (16,N,10,10)
    y = maxpool2x2_cnhw(y)                                   # (16,N,5,5)
    flat = y.transpose(1, 0, 2, 3).reshape(N, 16 * 5 * 5)    # (N,400), torch order
    return fc_tail(flat, q)                                  # (N,10)


if __name__ == "__main__":
    key = jax.random.PRNGKey(0)
    k_in, k_par = jax.random.split(key)

    # Input must be 32x32 so the flattened features are 16*5*5 = 400.
    x = jax.random.normal(k_in, (2, 3, 32, 32), dtype=jnp.float32)
    params = init_params(k_par)
    q = prepare_params(params)

    fwd = jax.jit(net_forward)
    out = jax.block_until_ready(fwd(q, x))
    assert out.shape == (2, 10), out.shape
    assert bool(jnp.all(jnp.isfinite(out)))
    print("KERNEL_OK")
</pallas_src>

<mosaic_0001>
module attributes {stable_mosaic.version = 11 : i64} {
  func.func @_conv_mm_kernel(%arg0: i32, %arg1: memref<1024x128xbf16, #tpu.memory_space<vmem>>, %arg2: memref<8x128xbf16, #tpu.memory_space<vmem>>, %arg3: memref<8x1xf32, #tpu.memory_space<vmem>>, %arg4: memref<8x1024xf32, #tpu.memory_space<vmem>>) attributes {dimension_semantics = [#tpu.dimension_semantics<parallel>], iteration_bounds = array<i64: 2>, scalar_prefetch = 0 : i64, scratch_operands = 0 : i64, tpu.core_type = #tpu.core_type<tc>, window_params = [{transform_indices = @transform_0, window_bounds = array<i64: 1024, 128>}, {pipeline_mode = #tpu.pipeline_mode<synchronous>, transform_indices = @transform_1, window_bounds = array<i64: 8, 128>}, {pipeline_mode = #tpu.pipeline_mode<synchronous>, transform_indices = @transform_2, window_bounds = array<i64: 8, 1>}, {transform_indices = @transform_3, window_bounds = array<i64: 8, 1024>}]} {
    %c0 = arith.constant 0 : index
    %c0_0 = arith.constant 0 : index
    %0 = vector.load %arg2[%c0, %c0_0] : memref<8x128xbf16, #tpu.memory_space<vmem>>, vector<8x128xbf16>
    %c0_1 = arith.constant 0 : index
    %c0_2 = arith.constant 0 : index
    %1 = vector.load %arg1[%c0_1, %c0_2] : memref<1024x128xbf16, #tpu.memory_space<vmem>>, vector<1024x128xbf16>
    %cst = arith.constant dense<0.000000e+00> : vector<8x1024xf32>
    %2 = tpu.matmul %0, %1, %cst {dimension_numbers = #tpu.dot_dimension_numbers<[1], [1], [0], [0], [0, 0, 1, 0], [], []>} : vector<8x128xbf16>, vector<1024x128xbf16>, vector<8x1024xf32> -> vector<8x1024xf32>
    %c0_3 = arith.constant 0 : index
    %c0_4 = arith.constant 0 : index
    %3 = vector.load %arg3[%c0_3, %c0_4] : memref<8x1xf32, #tpu.memory_space<vmem>>, vector<8x1xf32>
    %4 = vector.broadcast %3 : vector<8x1xf32> to vector<8x1024xf32>
    %5 = arith.addf %2, %4 : vector<8x1024xf32>
    %cst_5 = arith.constant 0.000000e+00 : f32
    %6 = vector.broadcast %cst_5 : f32 to vector<8x1024xf32>
    %7 = arith.maximumf %5, %6 : vector<8x1024xf32>
    %c0_6 = arith.constant 0 : index
    %c0_7 = arith.constant 0 : index
    %8 = vector.load %arg4[%c0_6, %c0_7] : memref<8x1024xf32, #tpu.memory_space<vmem>>, vector<8x1024xf32>
    tpu.vector_store %arg4[%c0_6, %c0_7], %7 {strides = array<i32>} : memref<8x1024xf32, #tpu.memory_space<vmem>>, vector<8x1024xf32>,
    return
  }
  func.func @transform_0(%arg0: i32) -> (i32, i32) {
    %c0_i32 = arith.constant 0 : i32
    %c0_i32_0 = arith.constant 0 : i32
    return %arg0, %c0_i32 : i32, i32
  }
  func.func @transform_1(%arg0: i32) -> (i32, i32) {
    %c0_i32 = arith.constant 0 : i32
    %c0_i32_0 = arith.constant 0 : i32
    %c0_i32_1 = arith.constant 0 : i32
    return %c0_i32, %c0_i32_0 : i32, i32
  }
  func.func @transform_2(%arg0: i32) -> (i32, i32) {
    %c0_i32 = arith.constant 0 : i32
    %c0_i32_0 = arith.constant 0 : i32
    %c0_i32_1 = arith.constant 0 : i32
    return %c0_i32, %c0_i32_0 : i32, i32
  }
  func.func @transform_3(%arg0: i32) -> (i32, i32) {
    %c0_i32 = arith.constant 0 : i32
    %c0_i32_0 = arith.constant 0 : i32
    return %c0_i32, %arg0 : i32, i32
  }
}

module attributes {stable_mosaic.version = 11 : i64} {
  func.func @_conv_mm_kernel(%arg0: i32, %arg1: memref<256x256xbf16, #tpu.memory_space<vmem>>, %arg2: memref<16x256xbf16, #tpu.memory_space<vmem>>, %arg3: memref<16x1xf32, #tpu.memory_space<vmem>>, %arg4: memref<16x256xf32, #tpu.memory_space<vmem>>) attributes {dimension_semantics = [#tpu.dimension_semantics<parallel>], iteration_bounds = array<i64: 1>, scalar_prefetch = 0 : i64, scratch_operands = 0 : i64, tpu.core_type = #tpu.core_type<tc>, window_params = [{transform_indices = @transform_0, window_bounds = array<i64: 256, 256>}, {pipeline_mode = #tpu.pipeline_mode<synchronous>, transform_indices = @transform_1, window_bounds = array<i64: 16, 256>}, {pipeline_mode = #tpu.pipeline_mode<synchronous>, transform_indices = @transform_2, window_bounds = array<i64: 16, 1>}, {transform_indices = @transform_3, window_bounds = array<i64: 16, 256>}]} {
    %c0 = arith.constant 0 : index
    %c0_0 = arith.constant 0 : index
    %0 = vector.load %arg2[%c0, %c0_0] : memref<16x256xbf16, #tpu.memory_space<vmem>>, vector<16x256xbf16>
    %c0_1 = arith.constant 0 : index
    %c0_2 = arith.constant 0 : index
    %1 = vector.load %arg1[%c0_1, %c0_2] : memref<256x256xbf16, #tpu.memory_space<vmem>>, vector<256x256xbf16>
    %cst = arith.constant dense<0.000000e+00> : vector<16x256xf32>
    %2 = tpu.matmul %0, %1, %cst {dimension_numbers = #tpu.dot_dimension_numbers<[1], [1], [0], [0], [0, 0, 1, 0], [], []>} : vector<16x256xbf16>, vector<256x256xbf16>, vector<16x256xf32> -> vector<16x256xf32>
    %c0_3 = arith.constant 0 : index
    %c0_4 = arith.constant 0 : index
    %3 = vector.load %arg3[%c0_3, %c0_4] : memref<16x1xf32, #tpu.memory_space<vmem>>, vector<16x1xf32>
    %4 = vector.broadcast %3 : vector<16x1xf32> to vector<16x256xf32>
    %5 = arith.addf %2, %4 : vector<16x256xf32>
    %cst_5 = arith.constant 0.000000e+00 : f32
    %6 = vector.broadcast %cst_5 : f32 to vector<16x256xf32>
    %7 = arith.maximumf %5, %6 : vector<16x256xf32>
    %c0_6 = arith.constant 0 : index
    %c0_7 = arith.constant 0 : index
    %8 = vector.load %arg4[%c0_6, %c0_7] : memref<16x256xf32, #tpu.memory_space<vmem>>, vector<16x256xf32>
    tpu.vector_store %arg4[%c0_6, %c0_7], %7 {strides = array<i32>} : memref<16x256xf32, #tpu.memory_space<vmem>>, vector<16x256xf32>,
    return
  }
  func.func @transform_0(%arg0: i32) -> (i32, i32) {
    %c0_i32 = arith.constant 0 : i32
    %c0_i32_0 = arith.constant 0 : i32
    return %arg0, %c0_i32 : i32, i32
  }
  func.func @transform_1(%arg0: i32) -> (i32, i32) {
    %c0_i32 = arith.constant 0 : i32
    %c0_i32_0 = arith.constant 0 : i32
    %c0_i32_1 = arith.constant 0 : i32
    return %c0_i32, %c0_i32_0 : i32, i32
  }
  func.func @transform_2(%arg0: i32) -> (i32, i32) {
    %c0_i32 = arith.constant 0 : i32
    %c0_i32_0 = arith.constant 0 : i32
    %c0_i32_1 = arith.constant 0 : i32
    return %c0_i32, %c0_i32_0 : i32, i32
  }
  func.func @transform_3(%arg0: i32) -> (i32, i32) {
    %c0_i32 = arith.constant 0 : i32
    %c0_i32_0 = arith.constant 0 : i32
    return %c0_i32, %arg0 : i32, i32
  }
}

module attributes {stable_mosaic.version = 11 : i64} {
  func.func @_fc_tail_kernel(%arg0: i32, %arg1: memref<8x512xf32, #tpu.memory_space<vmem>>, %arg2: memref<512x128xbf16, #tpu.memory_space<vmem>>, %arg3: memref<1x128xf32, #tpu.memory_space<vmem>>, %arg4: memref<128x128xbf16, #tpu.memory_space<vmem>>, %arg5: memref<1x128xf32, #tpu.memory_space<vmem>>, %arg6: memref<128x128xbf16, #tpu.memory_space<vmem>>, %arg7: memref<1x128xf32, #tpu.memory_space<vmem>>, %arg8: memref<8x128xf32, #tpu.memory_space<vmem>>) attributes {dimension_semantics = [#tpu.dimension_semantics<arbitrary>], iteration_bounds = array<i64: 1>, scalar_prefetch = 0 : i64, scratch_operands = 0 : i64, tpu.core_type = #tpu.core_type<tc>, window_params = [{pipeline_mode = #tpu.pipeline_mode<synchronous>, transform_indices = @transform_0, window_bounds = array<i64: 8, 512>}, {pipeline_mode = #tpu.pipeline_mode<synchronous>, transform_indices = @transform_1, window_bounds = array<i64: 512, 128>}, {pipeline_mode = #tpu.pipeline_mode<synchronous>, transform_indices = @transform_2, window_bounds = array<i64: 1, 128>}, {pipeline_mode = #tpu.pipeline_mode<synchronous>, transform_indices = @transform_3, window_bounds = array<i64: 128, 128>}, {pipeline_mode = #tpu.pipeline_mode<synchronous>, transform_indices = @transform_4, window_bounds = array<i64: 1, 128>}, {pipeline_mode = #tpu.pipeline_mode<synchronous>, transform_indices = @transform_5, window_bounds = array<i64: 128, 128>}, {pipeline_mode = #tpu.pipeline_mode<synchronous>, transform_indices = @transform_6, window_bounds = array<i64: 1, 128>}, {pipeline_mode = #tpu.pipeline_mode<synchronous>, transform_indices = @transform_7, window_bounds = array<i64: 8, 128>}]} {
    %c0 = arith.constant 0 : index
    %c0_0 = arith.constant 0 : index
    %0 = vector.load %arg1[%c0, %c0_0] : memref<8x512xf32, #tpu.memory_space<vmem>>, vector<8x512xf32>
    %1 = tpu.iota {dimensions = array<i32: 0>} : vector<8x1xi32>
    %c2_i32 = arith.constant 2 : i32
    %2 = vector.broadcast %c2_i32 : i32 to vector<8x1xi32>
    %3 = arith.cmpi slt, %1, %2 : vector<8x1xi32>
    %cst = arith.constant dense<0.000000e+00> : vector<512xf32>
    %4 = vector.multi_reduction <add>, %0, %cst [0] : vector<8x512xf32> to vector<512xf32>
    %5 = vector.shape_cast %4 : vector<512xf32> to vector<1x512xf32>
    %cst_1 = arith.constant 5.000000e-01 : f32
    %6 = vector.broadcast %cst_1 : f32 to vector<1x512xf32>
    %7 = arith.mulf %5, %6 : vector<1x512xf32>
    %8 = vector.broadcast %7 : vector<1x512xf32> to vector<8x512xf32>
    %9 = arith.subf %0, %8 : vector<8x512xf32>
    %cst_2 = arith.constant 0.000000e+00 : f32
    %10 = vector.shape_cast %3 : vector<8x1xi1> to vector<8x1xi1>
    %11 = vector.broadcast %10 : vector<8x1xi1> to vector<8x512xi1>
    %12 = vector.broadcast %cst_2 : f32 to vector<8x512xf32>
    %13 = arith.select %11, %9, %12 : vector<8x512xi1>, vector<8x512xf32>
    %14 = arith.mulf %13, %13 : vector<8x512xf32>
    %cst_3 = arith.constant dense<0.000000e+00> : vector<512xf32>
    %15 = vector.multi_reduction <add>, %14, %cst_3 [0] : vector<8x512xf32> to vector<512xf32>
    %16 = vector.shape_cast %15 : vector<512xf32> to vector<1x512xf32>
    %cst_4 = arith.constant 5.000000e-01 : f32
    %17 = vector.broadcast %cst_4 : f32 to vector<1x512xf32>
    %18 = arith.mulf %16, %17 : vector<1x512xf32>
    %cst_5 = arith.constant 9.99999974E-6 : f32
    %19 = vector.broadcast %cst_5 : f32 to vector<1x512xf32>
    %20 = arith.addf %18, %19 : vector<1x512xf32>
    %21 = math.rsqrt %20 : vector<1x512xf32>
    %22 = vector.broadcast %21 : vector<1x512xf32> to vector<8x512xf32>
    %23 = arith.mulf %13, %22 : vector<8x512xf32>
    %24 = arith.truncf %23 : vector<8x512xf32> to vector<8x512xbf16>
    %c0_6 = arith.constant 0 : index
    %c0_7 = arith.constant 0 : index
    %25 = vector.load %arg2[%c0_6, %c0_7] : memref<512x128xbf16, #tpu.memory_space<vmem>>, vector<512x128xbf16>
    %cst_8 = arith.constant dense<0.000000e+00> : vector<8x128xf32>
    %26 = tpu.matmul %24, %25, %cst_8 {dimension_numbers = #tpu.dot_dimension_numbers<[1], [0], [0], [1], [0, 0, 1, 1], [], []>} : vector<8x512xbf16>, vector<512x128xbf16>, vector<8x128xf32> -> vector<8x128xf32>
    %c0_9 = arith.constant 0 : index
    %c0_10 = arith.constant 0 : index
    %27 = vector.load %arg3[%c0_9, %c0_10] : memref<1x128xf32, #tpu.memory_space<vmem>>, vector<1x128xf32>
    %28 = vector.broadcast %27 : vector<1x128xf32> to vector<8x128xf32>
    %29 = arith.addf %26, %28 : vector<8x128xf32>
    %cst_11 = arith.constant 0.000000e+00 : f32
    %30 = vector.broadcast %cst_11 : f32 to vector<8x128xf32>
    %31 = arith.maximumf %29, %30 : vector<8x128xf32>
    %32 = arith.truncf %31 : vector<8x128xf32> to vector<8x128xbf16>
    %c0_12 = arith.constant 0 : index
    %c0_13 = arith.constant 0 : index
    %33 = vector.load %arg4[%c0_12, %c0_13] : memref<128x128xbf16, #tpu.memory_space<vmem>>, vector<128x128xbf16>
    %cst_14 = arith.constant dense<0.000000e+00> : vector<8x128xf32>
    %34 = tpu.matmul %32, %33, %cst_14 {dimension_numbers = #tpu.dot_dimension_numbers<[1], [0], [0], [1], [0, 0, 1, 1], [], []>} : vector<8x128xbf16>, vector<128x128xbf16>, vector<8x128xf32> -> vector<8x128xf32>
    %c0_15 = arith.constant 0 : index
    %c0_16 = arith.constant 0 : index
    %35 = vector.load %arg5[%c0_15, %c0_16] : memref<1x128xf32, #tpu.memory_space<vmem>>, vector<1x128xf32>
    %36 = vector.broadcast %35 : vector<1x128xf32> to vector<8x128xf32>
    %37 = arith.addf %34, %36 : vector<8x128xf32>
    %cst_17 = arith.constant 0.000000e+00 : f32
    %38 = vector.broadcast %cst_17 : f32 to vector<8x128xf32>
    %39 = arith.maximumf %37, %38 : vector<8x128xf32>
    %40 = arith.truncf %39 : vector<8x128xf32> to vector<8x128xbf16>
    %c0_18 = arith.constant 0 : index
    %c0_19 = arith.constant 0 : index
    %41 = vector.load %arg6[%c0_18, %c0_19] : memref<128x128xbf16, #tpu.memory_space<vmem>>, vector<128x128xbf16>
    %cst_20 = arith.constant dense<0.000000e+00> : vector<8x128xf32>
    %42 = tpu.matmul %40, %41, %cst_20 {dimension_numbers = #tpu.dot_dimension_numbers<[1], [0], [0], [1], [0, 0, 1, 1], [], []>} : vector<8x128xbf16>, vector<128x128xbf16>, vector<8x128xf32> -> vector<8x128xf32>
    %c0_21 = arith.constant 0 : index
    %c0_22 = arith.constant 0 : index
    %43 = vector.load %arg7[%c0_21, %c0_22] : memref<1x128xf32, #tpu.memory_space<vmem>>, vector<1x128xf32>
    %44 = vector.broadcast %43 : vector<1x128xf32> to vector<8x128xf32>
    %45 = arith.addf %42, %44 : vector<8x128xf32>
    %c0_23 = arith.constant 0 : index
    %c0_24 = arith.constant 0 : index
    %46 = vector.load %arg8[%c0_23, %c0_24] : memref<8x128xf32, #tpu.memory_space<vmem>>, vector<8x128xf32>
    tpu.vector_store %arg8[%c0_23, %c0_24], %45 {strides = array<i32>} : memref<8x128xf32, #tpu.memory_space<vmem>>, vector<8x128xf32>,
    return
  }
  func.func @transform_0(%arg0: i32) -> (i32, i32) {
    %c0_i32 = arith.constant 0 : i32
    %c0_i32_0 = arith.constant 0 : i32
    %c0_i32_1 = arith.constant 0 : i32
    return %c0_i32, %c0_i32_0 : i32, i32
  }
  func.func @transform_1(%arg0: i32) -> (i32, i32) {
    %c0_i32 = arith.constant 0 : i32
    %c0_i32_0 = arith.constant 0 : i32
    %c0_i32_1 = arith.constant 0 : i32
    return %c0_i32, %c0_i32_0 : i32, i32
  }
  func.func @transform_2(%arg0: i32) -> (i32, i32) {
    %c0_i32 = arith.constant 0 : i32
    %c0_i32_0 = arith.constant 0 : i32
    %c0_i32_1 = arith.constant 0 : i32
    return %c0_i32, %c0_i32_0 : i32, i32
  }
  func.func @transform_3(%arg0: i32) -> (i32, i32) {
    %c0_i32 = arith.constant 0 : i32
    %c0_i32_0 = arith.constant 0 : i32
    %c0_i32_1 = arith.constant 0 : i32
    return %c0_i32, %c0_i32_0 : i32, i32
  }
  func.func @transform_4(%arg0: i32) -> (i32, i32) {
    %c0_i32 = arith.constant 0 : i32
    %c0_i32_0 = arith.constant 0 : i32
    %c0_i32_1 = arith.constant 0 : i32
    return %c0_i32, %c0_i32_0 : i32, i32
  }
  func.func @transform_5(%arg0: i32) -> (i32, i32) {
    %c0_i32 = arith.constant 0 : i32
    %c0_i32_0 = arith.constant 0 : i32
    %c0_i32_1 = arith.constant 0 : i32
    return %c0_i32, %c0_i32_0 : i32, i32
  }
  func.func @transform_6(%arg0: i32) -> (i32, i32) {
    %c0_i32 = arith.constant 0 : i32
    %c0_i32_0 = arith.constant 0 : i32
    %c0_i32_1 = arith.constant 0 : i32
    return %c0_i32, %c0_i32_0 : i32, i32
  }
  func.func @transform_7(%arg0: i32) -> (i32, i32) {
    %c0_i32 = arith.constant 0 : i32
    %c0_i32_0 = arith.constant 0 : i32
    %c0_i32_1 = arith.constant 0 : i32
    return %c0_i32, %c0_i32_0 : i32, i32
  }
}

</mosaic_0001>

<bundles_post_ra>
// kernel: net_forward.3
= control target key start
LH: loop header
LB: loop body
LE: loop exit
PB: predicated region body
PF: predicated region fallthrough
CT: control target
= control target key end

     0   :  { %s1239_s12 = smov 0   ;;  %s1342_s0 = inlined_call_operand.vmem [shape: bf16[2048,128], index: 0, kind: input, shape index: {}]   ;;  %s1343_s1 = inlined_call_operand.vmem [shape: bf16[8,128], index: 1, kind: input, shape index: {}]   ;;  %s1344_s2 = inlined_call_operand.vmem [shape: f32[8,1], index: 2, kind: input, shape index: {}]   ;;  %s1345_s3 = inlined_call_operand.vmem [shape: f32[8,2048], index: 3, kind: output, shape index: {}]  }
   0x1 LB: > { %s869_s13 = sadd.s32 4294967295, %s1216_s12   ;;  %p873_p0 = scmp.ge.s32.totalorder %s1216_s12, 1  ;;  %s1216_s12 = sphi %s1239_s12, %s13_s12  }
   0x2   : > { %p138_p1 = scmp.lt.s32.totalorder %s1216_s12, 3 }
   0x4   : > { %p139_p2 = pnand %p873_p0, %p138_p1 }
   0x5   : > { %s874_s14 = sshll.u32 (!%p139_p2), %s869_s13, 7  ;;  %s876_s23 = sshll.u32 (!%p139_p2), %s869_s13, 3 }
   0x6   : > { %142 = sbr.rel (%p139_p2) target bundleno = 285 (0x11d), region = 32  ;;  %p163_p3 = scmp.lt.s32.totalorder (!%p139_p2), %s874_s14, 255 }
   0x7   : > { %p169_p4 = scmp.lt.s32.totalorder (!%p139_p2), %s876_s23, 15 }
   0xb   : > { %s1347_s14 = smov (!%p163_p3, %s874_s14), 255  ;;  %v1293_v36 = vld [vmem:[%s1343_s1] sm:$0xf]  ;;  %v1218_v49 = vmov 0   ;;  %s1349_s23 = smov (!%p169_p4, %s876_s23), 15 }
   0xc   : > { %s875_s15 = sshll.u32 %s1347_s14, 2  ;;  %1209 = vset.pattern.permute.xlu0 %v1218_v49  ;;  %v303_v54 = vld [vmem:[%s1344_s2] sm:$0xff]  ;;  %s877_s24 = sshll.u32 %s1349_s23, 3 }
   0xd   : > { %s1252_s18 = scalar_lea.vmem %s1342_s0, %s875_s15  ;;  %306 = vperm.xlu0 %1209, %v303_v54   ;;  %s172_s27 = scalar_lea.vmem %s1345_s3, %s877_s24 }
   0xe   : > { %v1143_v0 = vld [vmem:[%s1252_s18 + $0x38] sm:$0xff]  ;;  %v1142_v4 = vld [vmem:[%s1252_s18 + $0x30] sm:$0xff]  ;;  %v1141_v8 = vld [vmem:[%s1252_s18 + $0x28] sm:$0xff] }
   0xf   : > { %v1151_v1 = vld [vmem:[%s1252_s18 + $0x78] sm:$0xff]  ;;  %693 = vmatpush.bf16.xpose.msra.mxu0 %v1143_v0  ;;  %v1150_v5 = vld [vmem:[%s1252_s18 + $0x70] sm:$0xff]  ;;  %v1149_v9 = vld [vmem:[%s1252_s18 + $0x68] sm:$0xff] }
  0x10   : > { %v1159_v2 = vld [vmem:[%s1252_s18 + $0xb8] sm:$0xff]  ;;  %706 = vmatpush.bf16.xpose.msra.mxu1 %v1151_v1  ;;  %v1158_v6 = vld [vmem:[%s1252_s18 + $0xb0] sm:$0xff]  ;;  %v1157_v10 = vld [vmem:[%s1252_s18 + $0xa8] sm:$0xff] }
  0x11   : > { %v1167_v3 = vld [vmem:[%s1252_s18 + $0xf8] sm:$0xff]  ;;  %719 = vmatpush.bf16.xpose.msra.mxu2 %v1159_v2  ;;  %v1166_v7 = vld [vmem:[%s1252_s18 + $0xf0] sm:$0xff]  ;;  %v1165_v11 = vld [vmem:[%s1252_s18 + $0xe8] sm:$0xff] }
  0x12   : > { %732 = vmatpush.bf16.xpose.msra.mxu3 %v1167_v3  ;;  %v1140_v12 = vld [vmem:[%s1252_s18 + $0x20] sm:$0xff]  ;;  %v1139_v16 = vld [vmem:[%s1252_s18 + $0x18] sm:$0xff]  ;;  %v1138_v20 = vld [vmem:[%s1252_s18 + $0x10] sm:$0xff] }
  0x13   : > { %v1148_v13 = vld [vmem:[%s1252_s18 + $0x60] sm:$0xff]  ;;  %v1147_v17 = vld [vmem:[%s1252_s18 + $0x58] sm:$0xff]  ;;  %v1146_v21 = vld [vmem:[%s1252_s18 + $0x50] sm:$0xff] }
  0x14   : > { %v1156_v14 = vld [vmem:[%s1252_s18 + $0xa0] sm:$0xff]  ;;  %v1155_v18 = vld [vmem:[%s1252_s18 + $0x98] sm:$0xff]  ;;  %v1154_v22 = vld [vmem:[%s1252_s18 + $0x90] sm:$0xff] }
  0x15   : > { %v1164_v15 = vld [vmem:[%s1252_s18 + $0xe0] sm:$0xff]  ;;  %v1163_v19 = vld [vmem:[%s1252_s18 + $0xd8] sm:$0xff]  ;;  %v1162_v23 = vld [vmem:[%s1252_s18 + $0xd0] sm:$0xff] }
  0x16   : > { %v1137_v24 = vld [vmem:[%s1252_s18 + $0x8] sm:$0xff]  ;;  %v1136_v28 = vld [vmem:[%s1252_s18] sm:$0xff]  ;;  %v1175_v32 = vld [vmem:[%s1252_s18 + $0x138] sm:$0xff] }
  0x17   : > { %694 = vmatpush.bf16.xpose.msra.mxu0 %v1142_v4  ;;  %v1145_v25 = vld [vmem:[%s1252_s18 + $0x48] sm:$0xff]  ;;  %v1144_v29 = vld [vmem:[%s1252_s18 + $0x40] sm:$0xff]  ;;  %v1183_v33 = vld [vmem:[%s1252_s18 + $0x178] sm:$0xff] }
  0x18   : > { %707 = vmatpush.bf16.xpose.msra.mxu1 %v1150_v5  ;;  %v1153_v26 = vld [vmem:[%s1252_s18 + $0x88] sm:$0xff]  ;;  %v1152_v30 = vld [vmem:[%s1252_s18 + $0x80] sm:$0xff]  ;;  %v1191_v34 = vld [vmem:[%s1252_s18 + $0x1b8] sm:$0xff] }
  0x19   : > { %720 = vmatpush.bf16.xpose.msra.mxu2 %v1158_v6  ;;  %v1161_v27 = vld [vmem:[%s1252_s18 + $0xc8] sm:$0xff]  ;;  %v1160_v31 = vld [vmem:[%s1252_s18 + $0xc0] sm:$0xff]  ;;  %v1199_v35 = vld [vmem:[%s1252_s18 + $0x1f8] sm:$0xff] }
  0x1a   : > { %733 = vmatpush.bf16.xpose.msra.mxu3 %v1166_v7  ;;  %v1174_v37 = vld [vmem:[%s1252_s18 + $0x130] sm:$0xff]  ;;  %v1173_v41 = vld [vmem:[%s1252_s18 + $0x128] sm:$0xff]  ;;  %v1172_v45 = vld [vmem:[%s1252_s18 + $0x120] sm:$0xff] }
  0x1b   : > { %v1182_v38 = vld [vmem:[%s1252_s18 + $0x170] sm:$0xff]  ;;  %v1181_v42 = vld [vmem:[%s1252_s18 + $0x168] sm:$0xff]  ;;  %v1180_v46 = vld [vmem:[%s1252_s18 + $0x160] sm:$0xff] }
  0x1c   : > { %v1190_v39 = vld [vmem:[%s1252_s18 + $0x1b0] sm:$0xff]  ;;  %v1189_v43 = vld [vmem:[%s1252_s18 + $0x1a8] sm:$0xff]  ;;  %v1188_v47 = vld [vmem:[%s1252_s18 + $0x1a0] sm:$0xff] }
  0x1d   : > { %v1198_v40 = vld [vmem:[%s1252_s18 + $0x1f0] sm:$0xff]  ;;  %v1197_v44 = vld [vmem:[%s1252_s18 + $0x1e8] sm:$0xff]  ;;  %v1196_v48 = vld [vmem:[%s1252_s18 + $0x1e0] sm:$0xff] }
  0x1e   : > { %v1171_v50 = vld [vmem:[%s1252_s18 + $0x118] sm:$0xff]  ;;  %v1170_v55 = vld [vmem:[%s1252_s18 + $0x110] sm:$0xff]  ;;  %v1169_v59 = vld [vmem:[%s1252_s18 + $0x108] sm:$0xff] }
  0x1f   : > { %695 = vmatpush.bf16.xpose.msra.mxu0 %v1141_v8  ;;  %v1179_v51 = vld [vmem:[%s1252_s18 + $0x158] sm:$0xff]  ;;  %v1178_v56 = vld [vmem:[%s1252_s18 + $0x150] sm:$0xff]  ;;  %v1177_v60 = vld [vmem:[%s1252_s18 + $0x148] sm:$0xff] }
  0x20   : > { %708 = vmatpush.bf16.xpose.msra.mxu1 %v1149_v9  ;;  %v1187_v52 = vld [vmem:[%s1252_s18 + $0x198] sm:$0xff]  ;;  %v1186_v57 = vld [vmem:[%s1252_s18 + $0x190] sm:$0xff]  ;;  %v1185_v61 = vld [vmem:[%s1252_s18 + $0x188] sm:$0xff] }
  0x21   : > { %721 = vmatpush.bf16.xpose.msra.mxu2 %v1157_v10  ;;  %v1195_v53 = vld [vmem:[%s1252_s18 + $0x1d8] sm:$0xff]  ;;  %v1194_v58 = vld [vmem:[%s1252_s18 + $0x1d0] sm:$0xff]  ;;  %v1193_v62 = vld [vmem:[%s1252_s18 + $0x1c8] sm:$0xff] }
  0x22   : > { %734 = vmatpush.bf16.xpose.msra.mxu3 %v1165_v11  ;;  %v1168_v63 = vld [vmem:[%s1252_s18 + $0x100] sm:$0xff] }
  0x23   : > { %v1176_v0 = vld [vmem:[%s1252_s18 + $0x140] sm:$0xff] }
  0x24   : > { %v1184_v1 = vld [vmem:[%s1252_s18 + $0x180] sm:$0xff] }
  0x25   : > { %v1192_v2 = vld [vmem:[%s1252_s18 + $0x1c0] sm:$0xff] }
  0x27   : > { %696 = vmatpush.bf16.xpose.msra.mxu0 %v1140_v12 }
  0x28   : > { %709 = vmatpush.bf16.xpose.msra.mxu1 %v1148_v13 }
  0x29   : > { %722 = vmatpush.bf16.xpose.msra.mxu2 %v1156_v14 }
  0x2a   : > { %735 = vmatpush.bf16.xpose.msra.mxu3 %v1164_v15 }
  0x2f   : > { %697 = vmatpush.bf16.xpose.msra.mxu0 %v1139_v16 }
  0x30   : > { %710 = vmatpush.bf16.xpose.msra.mxu1 %v1147_v17 }
  0x31   : > { %723 = vmatpush.bf16.xpose.msra.mxu2 %v1155_v18 }
  0x32   : > { %736 = vmatpush.bf16.xpose.msra.mxu3 %v1163_v19 }
  0x37   : > { %698 = vmatpush.bf16.xpose.msra.mxu0 %v1138_v20 }
  0x38   : > { %711 = vmatpush.bf16.xpose.msra.mxu1 %v1146_v21 }
  0x39   : > { %724 = vmatpush.bf16.xpose.msra.mxu2 %v1154_v22 }
  0x3a   : > { %737 = vmatpush.bf16.xpose.msra.mxu3 %v1162_v23 }
  0x3f   : > { %699 = vmatpush.bf16.xpose.msra.mxu0 %v1137_v24 }
  0x40   : > { %712 = vmatpush.bf16.xpose.msra.mxu1 %v1145_v25 }
  0x41   : > { %725 = vmatpush.bf16.xpose.msra.mxu2 %v1153_v26 }
  0x42   : > { %738 = vmatpush.bf16.xpose.msra.mxu3 %v1161_v27 }
  0x47   : > { %700 = vmatpush.bf16.xpose.msra.mxu0 %v1136_v28 }
  0x48   : > { %713 = vmatpush.bf16.xpose.msra.mxu1 %v1144_v29 }
  0x49   : > { %726 = vmatpush.bf16.xpose.msra.mxu2 %v1152_v30 }
  0x4a   : > { %739 = vmatpush.bf16.xpose.msra.mxu3 %v1160_v31 }
  0x4e   : > { %701 = vmatmul.bf16.vlgmr.msra.gmra.mxu0 %v1293_v36 }
  0x4f   : > { %745 = vmatpush.bf16.xpose.msrb.mxu0 %v1175_v32  ;;  %714 = vmatmul.bf16.vlgmr.msra.gmra.mxu1 %v1293_v36 }
  0x50   : > { %758 = vmatpush.bf16.xpose.msrb.mxu1 %v1183_v33  ;;  %727 = vmatmul.bf16.vlgmr.msra.gmra.mxu2 %v1293_v36 }
  0x51   : > { %771 = vmatpush.bf16.xpose.msrb.mxu2 %v1191_v34  ;;  %740 = vmatmul.bf16.vlgmr.msra.gmra.mxu3 %v1293_v36 }
  0x52   : > { %784 = vmatpush.bf16.xpose.msrb.mxu3 %v1199_v35 }
  0x57   : > { %746 = vmatpush.bf16.xpose.msrb.mxu0 %v1174_v37 }
  0x58   : > { %759 = vmatpush.bf16.xpose.msrb.mxu1 %v1182_v38 }
  0x59   : > { %772 = vmatpush.bf16.xpose.msrb.mxu2 %v1190_v39 }
  0x5a   : > { %785 = vmatpush.bf16.xpose.msrb.mxu3 %v1198_v40 }
  0x5f   : > { %747 = vmatpush.bf16.xpose.msrb.mxu0 %v1173_v41 }
  0x60   : > { %760 = vmatpush.bf16.xpose.msrb.mxu1 %v1181_v42 }
  0x61   : > { %773 = vmatpush.bf16.xpose.msrb.mxu2 %v1189_v43 }
  0x62   : > { %786 = vmatpush.bf16.xpose.msrb.mxu3 %v1197_v44 }
  0x67   : > { %748 = vmatpush.bf16.xpose.msrb.mxu0 %v1172_v45 }
  0x68   : > { %761 = vmatpush.bf16.xpose.msrb.mxu1 %v1180_v46 }
  0x69   : > { %774 = vmatpush.bf16.xpose.msrb.mxu2 %v1188_v47 }
  0x6a   : > { %787 = vmatpush.bf16.xpose.msrb.mxu3 %v1196_v48 }
  0x6f   : > { %749 = vmatpush.bf16.xpose.msrb.mxu0 %v1171_v50 }
  0x70   : > { %762 = vmatpush.bf16.xpose.msrb.mxu1 %v1179_v51 }
  0x71   : > { %775 = vmatpush.bf16.xpose.msrb.mxu2 %v1187_v52 }
  0x72   : > { %788 = vmatpush.bf16.xpose.msrb.mxu3 %v1195_v53 }
  0x77   : > { %750 = vmatpush.bf16.xpose.msrb.mxu0 %v1170_v55 }
  0x78   : > { %763 = vmatpush.bf16.xpose.msrb.mxu1 %v1178_v56 }
  0x79   : > { %776 = vmatpush.bf16.xpose.msrb.mxu2 %v1186_v57 }
  0x7a   : > { %789 = vmatpush.bf16.xpose.msrb.mxu3 %v1194_v58 }
  0x7f   : > { %751 = vmatpush.bf16.xpose.msrb.mxu0 %v1169_v59  ;;  %v307_v11 = vpop.permute.xlu0 %306 }
  0x80   : > { %764 = vmatpush.bf16.xpose.msrb.mxu1 %v1177_v60 }
  0x81   : > { %777 = vmatpush.bf16.xpose.msrb.mxu2 %v1185_v61 }
  0x82   : > { %790 = vmatpush.bf16.xpose.msrb.mxu3 %v1193_v62 }
  0x87   : > { %752 = vmatpush.bf16.xpose.msrb.mxu0 %v1168_v63 }
  0x88   : > { %765 = vmatpush.bf16.xpose.msrb.mxu1 %v1176_v0 }
  0x89   : > { %778 = vmatpush.bf16.xpose.msrb.mxu2 %v1184_v1 }
  0x8a   : > { %791 = vmatpush.bf16.xpose.msrb.mxu3 %v1192_v2 }
  0x8e   : > { %753 = vmatmul.bf16.vlgmr.msrb.gmra.mxu0 %v1293_v36 }
  0x8f   : > { %766 = vmatmul.bf16.vlgmr.msrb.gmra.mxu1 %v1293_v36 }
  0x90   : > { %779 = vmatmul.bf16.vlgmr.msrb.gmra.mxu2 %v1293_v36 }
  0x91   : > { %792 = vmatmul.bf16.vlgmr.msrb.gmra.mxu3 %v1293_v36 }
  0xcb   : > { %v702_v3 = vpop.f32.mrf.mxu0 }
  0xcc   : > { %v715_v4 = vpop.f32.mrf.mxu1  ;;  %v703_v12 = vadd.f32 %v702_v3, %v307_v11 }
  0xcd   : > { %v716_v13 = vadd.f32 %v715_v4, %v307_v11 }
  0xce   : > { %v797_v16 = vmax.f32 %v703_v12, 0.0 }
  0xcf   : > { %v798_v17 = vmax.f32 %v716_v13, 0.0 }
  0xd0   : > { %805 = vst [vmem:[%s172_s27] sm:$0xff] %v797_v16 }
  0xd1   : > { %806 = vst [vmem:[%s172_s27 + $0x8] sm:$0xff] %v798_v17 }
  0xd3   : > { %v728_v5 = vpop.f32.mrf.mxu2  ;;  %v704_v7 = vpop.f32.mrf.mxu0 }
  0xd4   : > { %v741_v6 = vpop.f32.mrf.mxu3  ;;  %v717_v8 = vpop.f32.mrf.mxu1  ;;  %v729_v14 = vadd.f32 %v728_v5, %v307_v11 }
  0xd5   : > { %v742_v15 = vadd.f32 %v741_v6, %v307_v11 }
  0xd6   : > { %v799_v18 = vmax.f32 %v729_v14, 0.0 }
  0xd7   : > { %v800_v19 = vmax.f32 %v742_v15, 0.0 }
  0xd8   : > { %807 = vst [vmem:[%s172_s27 + $0x10] sm:$0xff] %v799_v18 }
  0xd9   : > { %808 = vst [vmem:[%s172_s27 + $0x18] sm:$0xff] %v800_v19 }
  0xdb   : > { %v730_v9 = vpop.f32.mrf.mxu2 }
  0xdc   : > { %v743_v10 = vpop.f32.mrf.mxu3 }
 0x10b   : > { %v754_v20 = vpop.f32.mrf.mxu0 }
 0x10c   : > { %v767_v21 = vpop.f32.mrf.mxu1  ;;  %v755_v22 = vadd.f32 %v754_v20, %v307_v11 }
 0x10d   : > { %v768_v23 = vadd.f32 %v767_v21, %v307_v11 }
 0x10e   : > { %v801_v24 = vmax.f32 %v755_v22, 0.0 }
 0x10f   : > { %v802_v25 = vmax.f32 %v768_v23, 0.0 }
 0x110   : > { %809 = vst [vmem:[%s172_s27 + $0x20] sm:$0xff] %v801_v24 }
 0x111   : > { %810 = vst [vmem:[%s172_s27 + $0x28] sm:$0xff] %v802_v25 }
 0x113   : > { %v780_v26 = vpop.f32.mrf.mxu2  ;;  %v756_v30 = vpop.f32.mrf.mxu0 }
 0x114   : > { %v793_v27 = vpop.f32.mrf.mxu3  ;;  %v781_v28 = vadd.f32 %v780_v26, %v307_v11  ;;  %v769_v31 = vpop.f32.mrf.mxu1 }
 0x115   : > { %v794_v29 = vadd.f32 %v793_v27, %v307_v11 }
 0x116   : > { %v803_v32 = vmax.f32 %v781_v28, 0.0 }
 0x117   : > { %v804_v33 = vmax.f32 %v794_v29, 0.0 }
 0x118   : > { %811 = vst [vmem:[%s172_s27 + $0x30] sm:$0xff] %v803_v32 }
 0x119   : > { %812 = vst [vmem:[%s172_s27 + $0x38] sm:$0xff] %v804_v33 }
 0x11b   : > { %v782_v34 = vpop.f32.mrf.mxu2 }
 0x11c   : > { %v795_v35 = vpop.f32.mrf.mxu3 }
 0x11d PF: > { %s13_s12 = sadd.s32 1, %s1216_s12  }
 0x11e   : > { %p10_p5 = scmp.ge.s32.totalorder %s13_s12, 4  }
 0x120   :  { %12 = sbr.rel (!%p10_p5) target bundleno = 1 (0x1), region = 62 }

// kernel: net_forward.4
= control target key start
LH: loop header
LB: loop body
LE: loop exit
PB: predicated region body
PF: predicated region fallthrough
CT: control target
= control target key end

     0   :  { %s713_s0 = inlined_call_operand.vmem [shape: bf16[256,256], index: 0, kind: input, shape index: {}]   ;;  %s714_s2 = inlined_call_operand.vmem [shape: f32[16,1], index: 2, kind: input, shape index: {}]   ;;  %s715_s1 = inlined_call_operand.vmem [shape: bf16[16,256], index: 1, kind: input, shape index: {}]   ;;  %s716_s3 = inlined_call_operand.vmem [shape: f32[16,256], index: 3, kind: output, shape index: {}]  }
   0x1   :  { %v364_v0 = vld [vmem:[%s713_s0 + $0x70] sm:$0xf]  ;;  %v451_v1 = vld [vmem:[%s713_s0 + $0x74] sm:$0xf0]  ;;  %v450_v2 = vld [vmem:[%s713_s0 + $0x74] sm:$0xf] }
   0x2   :  { %v365_v3 = vor.u32 %v451_v1, %v364_v0  ;;  %v366_v4 = vld [vmem:[%s713_s0 + $0x78] sm:$0xf0]  ;;  %v428_v5 = vld [vmem:[%s713_s0 + $0xf0] sm:$0xf]  ;;  %v467_v6 = vld [vmem:[%s713_s0 + $0xf4] sm:$0xf0] }
   0x3   :  { %v369_v7 = vor.u32 %v450_v2, %v366_v4  ;;  %v429_v8 = vor.u32 %v467_v6, %v428_v5  ;;  %v466_v9 = vld [vmem:[%s713_s0 + $0xf4] sm:$0xf]  ;;  %v430_v10 = vld [vmem:[%s713_s0 + $0xf8] sm:$0xf0]  ;;  %v356_v12 = vld [vmem:[%s713_s0 + $0x60] sm:$0xf] }
   0x4   :  { %230 = vmatpush.bf16.xpose.msra.mxu0 %v365_v3  ;;  %v433_v11 = vor.u32 %v466_v9, %v430_v10  ;;  %v449_v13 = vld [vmem:[%s713_s0 + $0x64] sm:$0xf0]  ;;  %v448_v14 = vld [vmem:[%s713_s0 + $0x64] sm:$0xf]  ;;  %v358_v15 = vld [vmem:[%s713_s0 + $0x68] sm:$0xf0] }
   0x5   :  { %244 = vmatpush.bf16.xpose.msra.mxu1 %v369_v7  ;;  %258 = vmatpush.bf16.xpose.msra.mxu2 %v429_v8  ;;  %v420_v16 = vld [vmem:[%s713_s0 + $0xe0] sm:$0xf]  ;;  %v465_v17 = vld [vmem:[%s713_s0 + $0xe4] sm:$0xf0]  ;;  %v464_v18 = vld [vmem:[%s713_s0 + $0xe4] sm:$0xf]  ;;  %v357_v20 = vor.u32 %v449_v13, %v356_v12  ;;  %v361_v21 = vor.u32 %v448_v14, %v358_v15 }
   0x6   :  { %272 = vmatpush.bf16.xpose.msra.mxu3 %v433_v11  ;;  %v422_v19 = vld [vmem:[%s713_s0 + $0xe8] sm:$0xf0]  ;;  %v421_v22 = vor.u32 %v465_v17, %v420_v16  ;;  %v348_v24 = vld [vmem:[%s713_s0 + $0x50] sm:$0xf]  ;;  %v447_v25 = vld [vmem:[%s713_s0 + $0x54] sm:$0xf0] }
   0x7   :  { %v425_v23 = vor.u32 %v464_v18, %v422_v19  ;;  %v446_v26 = vld [vmem:[%s713_s0 + $0x54] sm:$0xf]  ;;  %v350_v27 = vld [vmem:[%s713_s0 + $0x58] sm:$0xf0]  ;;  %v412_v28 = vld [vmem:[%s713_s0 + $0xd0] sm:$0xf]  ;;  %v349_v32 = vor.u32 %v447_v25, %v348_v24 }
   0x8   :  { %v463_v29 = vld [vmem:[%s713_s0 + $0xd4] sm:$0xf0]  ;;  %v462_v30 = vld [vmem:[%s713_s0 + $0xd4] sm:$0xf]  ;;  %v414_v31 = vld [vmem:[%s713_s0 + $0xd8] sm:$0xf0]  ;;  %v353_v33 = vor.u32 %v446_v26, %v350_v27 }
   0x9   :  { %v413_v34 = vor.u32 %v463_v29, %v412_v28  ;;  %v417_v35 = vor.u32 %v462_v30, %v414_v31  ;;  %v340_v36 = vld [vmem:[%s713_s0 + $0x40] sm:$0xf]  ;;  %v445_v37 = vld [vmem:[%s713_s0 + $0x44] sm:$0xf0]  ;;  %v444_v38 = vld [vmem:[%s713_s0 + $0x44] sm:$0xf] }
   0xa   :  { %v342_v39 = vld [vmem:[%s713_s0 + $0x48] sm:$0xf0]  ;;  %v404_v40 = vld [vmem:[%s713_s0 + $0xc0] sm:$0xf]  ;;  %v461_v41 = vld [vmem:[%s713_s0 + $0xc4] sm:$0xf0]  ;;  %v341_v44 = vor.u32 %v445_v37, %v340_v36 }
   0xb   :  { %v460_v42 = vld [vmem:[%s713_s0 + $0xc4] sm:$0xf]  ;;  %v406_v43 = vld [vmem:[%s713_s0 + $0xc8] sm:$0xf0]  ;;  %v345_v45 = vor.u32 %v444_v38, %v342_v39  ;;  %v405_v46 = vor.u32 %v461_v41, %v404_v40  ;;  %v332_v48 = vld [vmem:[%s713_s0 + $0x30] sm:$0xf] }
   0xc   :  { %231 = vmatpush.bf16.xpose.msra.mxu0 %v357_v20  ;;  %v409_v47 = vor.u32 %v460_v42, %v406_v43  ;;  %v443_v49 = vld [vmem:[%s713_s0 + $0x34] sm:$0xf0]  ;;  %v442_v50 = vld [vmem:[%s713_s0 + $0x34] sm:$0xf]  ;;  %v334_v51 = vld [vmem:[%s713_s0 + $0x38] sm:$0xf0] }
   0xd   :  { %245 = vmatpush.bf16.xpose.msra.mxu1 %v361_v21  ;;  %259 = vmatpush.bf16.xpose.msra.mxu2 %v421_v22  ;;  %v396_v52 = vld [vmem:[%s713_s0 + $0xb0] sm:$0xf]  ;;  %v459_v53 = vld [vmem:[%s713_s0 + $0xb4] sm:$0xf0]  ;;  %v458_v54 = vld [vmem:[%s713_s0 + $0xb4] sm:$0xf]  ;;  %v333_v56 = vor.u32 %v443_v49, %v332_v48  ;;  %v337_v57 = vor.u32 %v442_v50, %v334_v51 }
   0xe   :  { %273 = vmatpush.bf16.xpose.msra.mxu3 %v425_v23  ;;  %v398_v55 = vld [vmem:[%s713_s0 + $0xb8] sm:$0xf0]  ;;  %v397_v58 = vor.u32 %v459_v53, %v396_v52  ;;  %v324_v60 = vld [vmem:[%s713_s0 + $0x20] sm:$0xf]  ;;  %v441_v61 = vld [vmem:[%s713_s0 + $0x24] sm:$0xf0] }
   0xf   :  { %v401_v59 = vor.u32 %v458_v54, %v398_v55  ;;  %v440_v62 = vld [vmem:[%s713_s0 + $0x24] sm:$0xf]  ;;  %v326_v0 = vld [vmem:[%s713_s0 + $0x28] sm:$0xf0]  ;;  %v388_v1 = vld [vmem:[%s713_s0 + $0xa0] sm:$0xf]  ;;  %v325_v6 = vor.u32 %v441_v61, %v324_v60 }
  0x10   :  { %v48_v63 = vld [vmem:[%s714_s2] sm:$0xff]  ;;  %v457_v2 = vld [vmem:[%s713_s0 + $0xa4] sm:$0xf0]  ;;  %v470_v3 = vmov 0   ;;  %v390_v5 = vld [vmem:[%s713_s0 + $0xa8] sm:$0xf0]  ;;  %v329_v7 = vor.u32 %v440_v62, %v326_v0 }
  0x11   :  { %469 = vset.pattern.permute.xlu0 %v470_v3  ;;  %v456_v4 = vld [vmem:[%s713_s0 + $0xa4] sm:$0xf]  ;;  %v389_v8 = vor.u32 %v457_v2, %v388_v1  ;;  %v49_v10 = vld [vmem:[%s714_s2 + $0x8] sm:$0xff]  ;;  %v316_v11 = vld [vmem:[%s713_s0 + $0x10] sm:$0xf] }
  0x12   :  { %52 = vperm.xlu0 %469, %v48_v63   ;;  %v393_v9 = vor.u32 %v456_v4, %v390_v5  ;;  %v439_v12 = vld [vmem:[%s713_s0 + $0x14] sm:$0xf0]  ;;  %v438_v13 = vld [vmem:[%s713_s0 + $0x14] sm:$0xf]  ;;  %v318_v14 = vld [vmem:[%s713_s0 + $0x18] sm:$0xf0] }
  0x13   :  { %v380_v15 = vld [vmem:[%s713_s0 + $0x90] sm:$0xf]  ;;  %v455_v16 = vld [vmem:[%s713_s0 + $0x94] sm:$0xf0]  ;;  %v454_v17 = vld [vmem:[%s713_s0 + $0x94] sm:$0xf]  ;;  %v317_v19 = vor.u32 %v439_v12, %v316_v11  ;;  %v321_v20 = vor.u32 %v438_v13, %v318_v14 }
  0x14   :  { %232 = vmatpush.bf16.xpose.msra.mxu0 %v349_v32  ;;  %v382_v18 = vld [vmem:[%s713_s0 + $0x98] sm:$0xf0]  ;;  %v381_v21 = vor.u32 %v455_v16, %v380_v15  ;;  %v308_v23 = vld [vmem:[%s713_s0] sm:$0xf]  ;;  %v437_v24 = vld [vmem:[%s713_s0 + $0x4] sm:$0xf0] }
  0x15   :  { %246 = vmatpush.bf16.xpose.msra.mxu1 %v353_v33  ;;  %260 = vmatpush.bf16.xpose.msra.mxu2 %v413_v34  ;;  %v385_v22 = vor.u32 %v454_v17, %v382_v18  ;;  %v436_v25 = vld [vmem:[%s713_s0 + $0x4] sm:$0xf]  ;;  %v310_v26 = vld [vmem:[%s713_s0 + $0x8] sm:$0xf0]  ;;  %v372_v27 = vld [vmem:[%s713_s0 + $0x80] sm:$0xf]  ;;  %v309_v31 = vor.u32 %v437_v24, %v308_v23 }
  0x16   :  { %274 = vmatpush.bf16.xpose.msra.mxu3 %v417_v35  ;;  %v453_v28 = vld [vmem:[%s713_s0 + $0x84] sm:$0xf0]  ;;  %v452_v29 = vld [vmem:[%s713_s0 + $0x84] sm:$0xf]  ;;  %v374_v30 = vld [vmem:[%s713_s0 + $0x88] sm:$0xf0]  ;;  %v313_v32 = vor.u32 %v436_v25, %v310_v26 }
  0x17   :  { %v373_v33 = vor.u32 %v453_v28, %v372_v27  ;;  %v377_v34 = vor.u32 %v452_v29, %v374_v30  ;;  %v300_v35 = vld [vmem:[%s715_s1] sm:$0xf]  ;;  %v435_v36 = vld [vmem:[%s715_s1 + $0x4] sm:$0xf0]  ;;  %v434_v37 = vld [vmem:[%s715_s1 + $0x4] sm:$0xf] }
  0x18   :  { %v302_v38 = vld [vmem:[%s715_s1 + $0x8] sm:$0xf0]  ;;  %v301_v39 = vor.u32 %v435_v36, %v300_v35 }
  0x19   :  { %v305_v40 = vor.u32 %v434_v37, %v302_v38 }
  0x1a   :  { %57 = vperm.xlu0 %469, %v49_v10  }
  0x1c   :  { %233 = vmatpush.bf16.xpose.msra.mxu0 %v341_v44 }
  0x1d   :  { %247 = vmatpush.bf16.xpose.msra.mxu1 %v345_v45  ;;  %261 = vmatpush.bf16.xpose.msra.mxu2 %v405_v46 }
  0x1e   :  { %275 = vmatpush.bf16.xpose.msra.mxu3 %v409_v47 }
  0x24   :  { %234 = vmatpush.bf16.xpose.msra.mxu0 %v333_v56 }
  0x25   :  { %248 = vmatpush.bf16.xpose.msra.mxu1 %v337_v57  ;;  %262 = vmatpush.bf16.xpose.msra.mxu2 %v397_v58 }
  0x26   :  { %276 = vmatpush.bf16.xpose.msra.mxu3 %v401_v59 }
  0x2c   :  { %235 = vmatpush.bf16.xpose.msra.mxu0 %v325_v6 }
  0x2d   :  { %249 = vmatpush.bf16.xpose.msra.mxu1 %v329_v7  ;;  %263 = vmatpush.bf16.xpose.msra.mxu2 %v389_v8 }
  0x2e   :  { %277 = vmatpush.bf16.xpose.msra.mxu3 %v393_v9 }
  0x34   :  { %236 = vmatpush.bf16.xpose.msra.mxu0 %v317_v19 }
  0x35   :  { %250 = vmatpush.bf16.xpose.msra.mxu1 %v321_v20  ;;  %264 = vmatpush.bf16.xpose.msra.mxu2 %v381_v21 }
  0x36   :  { %278 = vmatpush.bf16.xpose.msra.mxu3 %v385_v22 }
  0x3c   :  { %237 = vmatpush.bf16.xpose.msra.mxu0 %v309_v31 }
  0x3d   :  { %251 = vmatpush.bf16.xpose.msra.mxu1 %v313_v32  ;;  %265 = vmatpush.bf16.xpose.msra.mxu2 %v373_v33 }
  0x3e   :  { %279 = vmatpush.bf16.xpose.msra.mxu3 %v377_v34 }
  0x43   :  { %238 = vmatmul.bf16.vlgmr.msra.gmra.mxu0 %v301_v39 }
  0x44   :  { %252 = vmatmul.bf16.vlgmr.msra.gmra.mxu1 %v305_v40  ;;  %266 = vmatmul.bf16.vlgmr.msra.gmra.mxu2 %v301_v39 }
  0x45   :  { %280 = vmatmul.bf16.vlgmr.msra.gmra.mxu3 %v305_v40 }
  0x84   :  { %v53_v41 = vpop.permute.xlu0 %52 }
  0x8c   :  { %v58_v47 = vpop.permute.xlu0 %57 }
  0xc0   :  { %v239_v42 = vpop.f32.mrf.mxu0 }
  0xc1   :  { %v240_v43 = vadd.f32 %v239_v42, %v53_v41  ;;  %v253_v44 = vpop.f32.mrf.mxu1 }
  0xc3   :  { %v254_v45 = vadd.f32 %v253_v44, %v240_v43 }
  0xc5   :  { %v286_v46 = vmax.f32 %v254_v45, 0.0 }
  0xc7   :  { %290 = vst [vmem:[%s716_s3] sm:$0xff] %v286_v46  ;;  %v267_v48 = vpop.f32.mrf.mxu2 }
  0xc8   :  { %v268_v49 = vadd.f32 %v267_v48, %v53_v41  ;;  %v281_v50 = vpop.f32.mrf.mxu3  ;;  %v241_v51 = vpop.f32.mrf.mxu0 }
  0xc9   :  { %v242_v52 = vadd.f32 %v241_v51, %v58_v47  ;;  %v255_v54 = vpop.f32.mrf.mxu1 }
  0xca   :  { %v282_v53 = vadd.f32 %v281_v50, %v268_v49 }
  0xcb   :  { %v256_v55 = vadd.f32 %v255_v54, %v242_v52 }
  0xcc   :  { %v287_v56 = vmax.f32 %v282_v53, 0.0 }
  0xcd   :  { %v288_v57 = vmax.f32 %v256_v55, 0.0 }
  0xce   :  { %291 = vst [vmem:[%s716_s3 + $0x8] sm:$0xff] %v287_v56 }
  0xcf   :  { %292 = vst [vmem:[%s716_s3 + $0x10] sm:$0xff] %v288_v57  ;;  %v269_v58 = vpop.f32.mrf.mxu2 }
  0xd0   :  { %v270_v59 = vadd.f32 %v269_v58, %v58_v47  ;;  %v283_v60 = vpop.f32.mrf.mxu3 }
  0xd2   :  { %v284_v61 = vadd.f32 %v283_v60, %v270_v59 }
  0xd4   :  { %v289_v62 = vmax.f32 %v284_v61, 0.0 }
  0xd6   :  { %293 = vst [vmem:[%s716_s3 + $0x18] sm:$0xff] %v289_v62 }

// kernel: net_forward.5
= control target key start
LH: loop header
LB: loop body
LE: loop exit
PB: predicated region body
PF: predicated region fallthrough
CT: control target
= control target key end

     0   :  { %v30_v33 = vlaneseq  ;;  %s1141_s1 = inlined_call_operand.vmem [shape: bf16[512,128], index: 1, kind: input, shape index: {}]   ;;  %s1142_s0 = inlined_call_operand.vmem [shape: f32[8,512], index: 0, kind: input, shape index: {}]   ;;  %s1143_s2 = inlined_call_operand.vmem [shape: f32[1,128], index: 2, kind: input, shape index: {}]   ;;  %s1144_s3 = inlined_call_operand.vmem [shape: bf16[128,128], index: 3, kind: input, shape index: {}]   ;;  %s1145_s4 = inlined_call_operand.vmem [shape: f32[1,128], index: 4, kind: input, shape index: {}]   ;;  %s1146_s5 = inlined_call_operand.vmem [shape: bf16[128,128], index: 5, kind: input, shape index: {}]   ;;  %s1147_s6 = inlined_call_operand.vmem [shape: f32[1,128], index: 6, kind: input, shape index: {}]   ;;  %s1148_s7 = inlined_call_operand.vmem [shape: f32[8,128], index: 7, kind: output, shape index: {}]  }
   0x1   :  { %v837_v0 = vld [vmem:[%s1141_s1 + $0x38] sm:$0xff]  ;;  %v836_v4 = vld [vmem:[%s1141_s1 + $0x30] sm:$0xff]  ;;  %v835_v8 = vld [vmem:[%s1141_s1 + $0x28] sm:$0xff] }
   0x2   :  { %v845_v1 = vld [vmem:[%s1141_s1 + $0x78] sm:$0xff]  ;;  %415 = vmatpush.bf16.msra.mxu0 %v837_v0  ;;  %v844_v5 = vld [vmem:[%s1141_s1 + $0x70] sm:$0xff]  ;;  %v843_v9 = vld [vmem:[%s1141_s1 + $0x68] sm:$0xff]  ;;  %v31_v46 = vshrl.u32 %v30_v33, 7 }
   0x3   :  { %v853_v2 = vld [vmem:[%s1141_s1 + $0xb8] sm:$0xff]  ;;  %428 = vmatpush.bf16.msra.mxu1 %v845_v1  ;;  %v852_v6 = vld [vmem:[%s1141_s1 + $0xb0] sm:$0xff]  ;;  %v851_v10 = vld [vmem:[%s1141_s1 + $0xa8] sm:$0xff] }
   0x4   :  { %v861_v3 = vld [vmem:[%s1141_s1 + $0xf8] sm:$0xff]  ;;  %441 = vmatpush.bf16.msra.mxu2 %v853_v2  ;;  %v860_v7 = vld [vmem:[%s1141_s1 + $0xf0] sm:$0xff]  ;;  %v859_v11 = vld [vmem:[%s1141_s1 + $0xe8] sm:$0xff]  ;;  %vm32_vm0 = vcmp.lt.s32.totalorder %v31_v46, 2 }
   0x5   :  { %454 = vmatpush.bf16.msra.mxu3 %v861_v3  ;;  %v834_v12 = vld [vmem:[%s1141_s1 + $0x20] sm:$0xff]  ;;  %v986_v18 = vld [vmem:[%s1142_s0 + $0x8] sm:$0xff]  ;;  %v991_v19 = vld [vmem:[%s1142_s0 + $0x10] sm:$0xff] }
   0x6   :  { %416 = vmatpush.bf16.msra.mxu0 %v836_v4  ;;  %v842_v13 = vld [vmem:[%s1141_s1 + $0x60] sm:$0xff]  ;;  %v996_v20 = vld [vmem:[%s1142_s0 + $0x18] sm:$0xff]  ;;  %v39_v21 = vrot.slane %v986_v18, 4  ;;  %v45_v22 = vrot.slane %v991_v19, 4  ;;  %v832_v38 = vld [vmem:[%s1141_s1 + $0x10] sm:$0xff] }
   0x7   :  { %429 = vmatpush.bf16.msra.mxu1 %v844_v5  ;;  %v850_v14 = vld [vmem:[%s1141_s1 + $0xa0] sm:$0xff]  ;;  %v51_v23 = vrot.slane %v996_v20, 4  ;;  %v833_v25 = vld [vmem:[%s1141_s1 + $0x18] sm:$0xff]  ;;  %v840_v39 = vld [vmem:[%s1141_s1 + $0x50] sm:$0xff] }
   0x8   :  { %442 = vmatpush.bf16.msra.mxu2 %v852_v6  ;;  %v858_v15 = vld [vmem:[%s1141_s1 + $0xe0] sm:$0xff]  ;;  %v841_v26 = vld [vmem:[%s1141_s1 + $0x58] sm:$0xff]  ;;  %v40_v27 = vadd.f32 %v39_v21, %v986_v18  ;;  %v46_v28 = vadd.f32 %v45_v22, %v991_v19  ;;  %v848_v43 = vld [vmem:[%s1141_s1 + $0x90] sm:$0xff] }
   0x9   :  { %455 = vmatpush.bf16.msra.mxu3 %v860_v7  ;;  %v980_v16 = vld [vmem:[%s1142_s0] sm:$0xff]  ;;  %v52_v29 = vadd.f32 %v51_v23, %v996_v20  ;;  %v849_v30 = vld [vmem:[%s1141_s1 + $0x98] sm:$0xff]  ;;  %v856_v44 = vld [vmem:[%s1141_s1 + $0xd0] sm:$0xff] }
   0xa   :  { %417 = vmatpush.bf16.msra.mxu0 %v835_v8  ;;  %v33_v17 = vrot.slane %v980_v16, 4  ;;  %v857_v31 = vld [vmem:[%s1141_s1 + $0xd8] sm:$0xff]  ;;  %v41_v34 = vrot.slane %v40_v27, 2  ;;  %v47_v35 = vrot.slane %v46_v28, 2  ;;  %v831_v51 = vld [vmem:[%s1141_s1 + $0x8] sm:$0xff]  ;;  %v830_v63 = vld [vmem:[%s1141_s1] sm:$0xff] }
   0xb   :  { %430 = vmatpush.bf16.msra.mxu1 %v843_v9  ;;  %v53_v36 = vrot.slane %v52_v29, 2  ;;  %v839_v52 = vld [vmem:[%s1141_s1 + $0x48] sm:$0xff]  ;;  %v838_v0 = vld [vmem:[%s1141_s1 + $0x40] sm:$0xff] }
   0xc   :  { %443 = vmatpush.bf16.msra.mxu2 %v851_v10  ;;  %v34_v24 = vadd.f32 %v33_v17, %v980_v16  ;;  %v42_v40 = vadd.f32 %v41_v34, %v40_v27  ;;  %v48_v41 = vadd.f32 %v47_v35, %v46_v28  ;;  %v847_v56 = vld [vmem:[%s1141_s1 + $0x88] sm:$0xff]  ;;  %v846_v4 = vld [vmem:[%s1141_s1 + $0x80] sm:$0xff]  ;;  %v869_v34 = vld [vmem:[%s1144_s3 + $0x38] sm:$0xff] }
   0xd   :  { %456 = vmatpush.bf16.msra.mxu3 %v859_v11  ;;  %v54_v42 = vadd.f32 %v53_v36, %v52_v29  ;;  %v855_v57 = vld [vmem:[%s1141_s1 + $0xc8] sm:$0xff]  ;;  %v854_v5 = vld [vmem:[%s1141_s1 + $0xc0] sm:$0xff] }
   0xe   :  { %418 = vmatpush.bf16.msra.mxu0 %v834_v12  ;;  %v35_v32 = vrot.slane %v34_v24, 2  ;;  %v43_v47 = vrot.slane %v42_v40, 1  ;;  %v49_v48 = vrot.slane %v48_v41, 1 }
   0xf   :  { %431 = vmatpush.bf16.msra.mxu1 %v842_v13  ;;  %v55_v49 = vrot.slane %v54_v42, 1 }
  0x10   :  { %444 = vmatpush.bf16.msra.mxu2 %v850_v14  ;;  %v36_v37 = vadd.f32 %v35_v32, %v34_v24  ;;  %v44_v53 = vadd.f32 %v43_v47, %v42_v40  ;;  %v50_v54 = vadd.f32 %v49_v48, %v48_v41 }
  0x11   :  { %457 = vmatpush.bf16.msra.mxu3 %v858_v15  ;;  %v56_v55 = vadd.f32 %v55_v49, %v54_v42  ;;  %v866_v49 = vld [vmem:[%s1144_s3 + $0x20] sm:$0xff] }
  0x12   :  { %419 = vmatpush.bf16.msra.mxu0 %v833_v25  ;;  %v37_v45 = vrot.slane %v36_v37, 1  ;;  %v58_v59 = vmul.f32 0.5, %v44_v53  ;;  %v59_v60 = vmul.f32 0.5, %v50_v54 }
  0x13   :  { %432 = vmatpush.bf16.msra.mxu1 %v841_v26  ;;  %v60_v61 = vmul.f32 0.5, %v56_v55 }
  0x14   :  { %445 = vmatpush.bf16.msra.mxu2 %v849_v30  ;;  %v38_v50 = vadd.f32 %v37_v45, %v36_v37  ;;  %v62_v1 = vsub.f32 %v986_v18, %v58_v59  ;;  %v63_v2 = vsub.f32 %v991_v19, %v59_v60  ;;  %v867_v45 = vld [vmem:[%s1144_s3 + $0x28] sm:$0xff] }
  0x15   :  { %458 = vmatpush.bf16.msra.mxu3 %v857_v31  ;;  %v64_v3 = vsub.f32 %v996_v20, %v60_v61 }
  0x16   :  { %420 = vmatpush.bf16.msra.mxu0 %v832_v38  ;;  %v57_v58 = vmul.f32 0.5, %v38_v50  ;;  %v1063_v8 = vsel %vm32_vm0, %v62_v1, 0.0  ;;  %v1066_v9 = vsel %vm32_vm0, %v63_v2, 0.0 }
  0x17   :  { %433 = vmatpush.bf16.msra.mxu1 %v840_v39  ;;  %v1069_v10 = vsel %vm32_vm0, %v64_v3, 0.0  ;;  %v72_v11 = vmul.f32 %v1063_v8, %v1063_v8  ;;  %v73_v12 = vmul.f32 %v1066_v9, %v1066_v9  ;;  %v868_v39 = vld [vmem:[%s1144_s3 + $0x30] sm:$0xff] }
  0x18   :  { %446 = vmatpush.bf16.msra.mxu2 %v848_v43  ;;  %v61_v62 = vsub.f32 %v980_v16, %v57_v58  ;;  %v74_v13 = vmul.f32 %v1069_v10, %v1069_v10 }
  0x19   :  { %459 = vmatpush.bf16.msra.mxu3 %v856_v44  ;;  %v81_v15 = vrot.slane %v72_v11, 4  ;;  %v87_v16 = vrot.slane %v73_v12, 4 }
  0x1a   :  { %421 = vmatpush.bf16.msra.mxu0 %v831_v51  ;;  %v1058_v6 = vsel %vm32_vm0, %v61_v62, 0.0  ;;  %v93_v17 = vrot.slane %v74_v13, 4 }
  0x1b   :  { %434 = vmatpush.bf16.msra.mxu1 %v839_v52  ;;  %v71_v7 = vmul.f32 %v1058_v6, %v1058_v6  ;;  %v82_v19 = vadd.f32 %v81_v15, %v72_v11  ;;  %v88_v20 = vadd.f32 %v87_v16, %v73_v12 }
  0x1c   :  { %447 = vmatpush.bf16.msra.mxu2 %v847_v56  ;;  %v94_v21 = vadd.f32 %v93_v17, %v74_v13 }
  0x1d   :  { %460 = vmatpush.bf16.msra.mxu3 %v855_v57  ;;  %v75_v14 = vrot.slane %v71_v7, 4  ;;  %v83_v23 = vrot.slane %v82_v19, 2  ;;  %v89_v24 = vrot.slane %v88_v20, 2 }
  0x1e   :  { %422 = vmatpush.bf16.msra.mxu0 %v830_v63  ;;  %v95_v25 = vrot.slane %v94_v21, 2 }
  0x1f   :  { %435 = vmatpush.bf16.msra.mxu1 %v838_v0  ;;  %v76_v18 = vadd.f32 %v75_v14, %v71_v7  ;;  %v84_v27 = vadd.f32 %v83_v23, %v82_v19  ;;  %v90_v28 = vadd.f32 %v89_v24, %v88_v20 }
  0x20   :  { %448 = vmatpush.bf16.msra.mxu2 %v846_v4  ;;  %v96_v29 = vadd.f32 %v95_v25, %v94_v21 }
  0x21   :  { %461 = vmatpush.bf16.msra.mxu3 %v854_v5  ;;  %v77_v22 = vrot.slane %v76_v18, 2  ;;  %v85_v31 = vrot.slane %v84_v27, 1  ;;  %v91_v32 = vrot.slane %v90_v28, 1 }
  0x22   :  { %v97_v33 = vrot.slane %v96_v29, 1  ;;  %537 = vmatpush.bf16.msrb.mxu0 %v869_v34 }
  0x23   :  { %v78_v26 = vadd.f32 %v77_v22, %v76_v18  ;;  %v86_v36 = vadd.f32 %v85_v31, %v84_v27  ;;  %v92_v37 = vadd.f32 %v91_v32, %v90_v28  ;;  %v876_v27 = vld [vmem:[%s1146_s5 + $0x30] sm:$0xff]  ;;  %v875_v28 = vld [vmem:[%s1146_s5 + $0x28] sm:$0xff]  ;;  %v873_v31 = vld [vmem:[%s1146_s5 + $0x18] sm:$0xff] }
  0x24   :  { %v98_v38 = vadd.f32 %v97_v33, %v96_v29  ;;  %v874_v29 = vld [vmem:[%s1146_s5 + $0x20] sm:$0xff] }
  0x25   :  { %v79_v30 = vrot.slane %v78_v26, 1  ;;  %v100_v41 = vmul.f32 0.5, %v86_v36  ;;  %v101_v42 = vmul.f32 0.5, %v92_v37 }
  0x26   :  { %v102_v43 = vmul.f32 0.5, %v98_v38  ;;  %538 = vmatpush.bf16.msrb.mxu0 %v868_v39 }
  0x27   :  { %v80_v35 = vadd.f32 %v79_v30, %v78_v26  ;;  %v104_v46 = vadd.f32 1e-05, %v100_v41  ;;  %v105_v47 = vadd.f32 1e-05, %v101_v42  ;;  %v877_v26 = vld [vmem:[%s1146_s5 + $0x38] sm:$0xff] }
  0x28   :  { %v106_v48 = vadd.f32 1e-05, %v102_v43  ;;  %620 = vmatpush.bf16.msrb.mxu1 %v877_v26  ;;  %v878_v30 = vld [vmem:[%s1143_s2] ss:$0 sm:$0xff] }
  0x29   :  { %v99_v40 = vmul.f32 0.5, %v80_v35  ;;  %vm123_vm3 = vweird.f32 %v104_v46  ;;  %vm133_vm5 = vweird.f32 %v105_v47  ;;  %v872_v35 = vld [vmem:[%s1146_s5 + $0x10] sm:$0xff] }
  0x2a   :  { %539 = vmatpush.bf16.msrb.mxu0 %v867_v45  ;;  %vm143_vm8 = vweird.f32 %v106_v48 }
  0x2b   :  { %v103_v44 = vadd.f32 1e-05, %v99_v40 }
  0x2c   :  { %621 = vmatpush.bf16.msrb.mxu1 %v876_v27 }
  0x2d   :  { %881 = vrsqrt.f32 %v103_v44  ;;  %vm113_vm1 = vweird.f32 %v103_v44 }
  0x2e   :  { %883 = vrsqrt.f32 %v104_v46  ;;  %540 = vmatpush.bf16.msrb.mxu0 %v866_v49  ;;  %v879_v49 = vld [vmem:[%s1145_s4] ss:$0 sm:$0xff] }
  0x2f   :  { %885 = vrsqrt.f32 %v105_v47 }
  0x30   :  { %887 = vrsqrt.f32 %v106_v48  ;;  %622 = vmatpush.bf16.msrb.mxu1 %v875_v28 }
  0x33   :  { %v882_v50 = vpop.eup %881 }
  0x34   :  { %v884_v51 = vpop.eup %883  ;;  %v108_v52 = vmul.f32 %v882_v50, %v103_v44  ;;  %vm114_vm2 = vweird.f32 %v882_v50  ;;  %623 = vmatpush.bf16.msrb.mxu1 %v874_v29 }
  0x35   :  { %v886_v53 = vpop.eup %885  ;;  %v118_v54 = vmul.f32 %v884_v51, %v104_v46  ;;  %vm124_vm4 = vweird.f32 %v884_v51  ;;  %vm115_vm7 = vmor %vm113_vm1, %vm114_vm2 }
  0x36   :  { %v888_v55 = vpop.eup %887  ;;  %v109_v56 = vmul.f32 %v882_v50, %v108_v52  ;;  %v128_v57 = vmul.f32 %v886_v53, %v105_v47  ;;  %vm134_vm6 = vweird.f32 %v886_v53  ;;  %vm125_vm10 = vmor %vm123_vm3, %vm124_vm4  ;;  %v871_v47 = vld [vmem:[%s1146_s5 + $0x8] sm:$0xff] }
  0x37   :  { %v119_v58 = vmul.f32 %v884_v51, %v118_v54  ;;  %v138_v59 = vmul.f32 %v888_v55, %v106_v48  ;;  %vm144_vm9 = vweird.f32 %v888_v55  ;;  %vm135_vm11 = vmor %vm133_vm5, %vm134_vm6  ;;  %v870_v48 = vld [vmem:[%s1146_s5] sm:$0xff] }
  0x38   :  { %v110_v60 = vmul.f32 0.5, %v109_v56  ;;  %v129_v61 = vmul.f32 %v886_v53, %v128_v57  ;;  %vm145_vm12 = vmor %vm143_vm8, %vm144_vm9  ;;  %624 = vmatpush.bf16.msrb.mxu1 %v873_v31 }
  0x39   :  { %v120_v62 = vmul.f32 0.5, %v119_v58  ;;  %v139_v63 = vmul.f32 %v888_v55, %v138_v59 }
  0x3a   :  { %v111_v0 = vsub.f32 1.5, %v110_v60  ;;  %v130_v1 = vmul.f32 0.5, %v129_v61 }
  0x3b   :  { %v121_v2 = vsub.f32 1.5, %v120_v62  ;;  %v140_v3 = vmul.f32 0.5, %v139_v63 }
  0x3c   :  { %v112_v4 = vmul.f32 %v882_v50, %v111_v0  ;;  %v131_v5 = vsub.f32 1.5, %v130_v1  ;;  %625 = vmatpush.bf16.msrb.mxu1 %v872_v35 }
  0x3d   :  { %v122_v7 = vmul.f32 %v884_v51, %v121_v2  ;;  %v141_v11 = vsub.f32 1.5, %v140_v3 }
  0x3e   :  { %v116_v12 = vsel %vm115_vm7, %v882_v50, %v112_v4  ;;  %v132_v13 = vmul.f32 %v886_v53, %v131_v5 }
  0x3f   :  { %v147_v14 = vmul.f32 %v116_v12, %v1058_v6  ;;  %v126_v15 = vsel %vm125_vm10, %v884_v51, %v122_v7  ;;  %v142_v16 = vmul.f32 %v888_v55, %v141_v11  ;;  %v865_v6 = vld [vmem:[%s1144_s3 + $0x18] sm:$0xff] }
  0x40   :  { %v148_v17 = vmul.f32 %v126_v15, %v1063_v8  ;;  %v136_v18 = vsel %vm135_vm11, %v886_v53, %v132_v13  ;;  %541 = vmatpush.bf16.msrb.mxu0 %v865_v6  ;;  %v864_v8 = vld [vmem:[%s1144_s3 + $0x10] sm:$0xff]  ;;  %626 = vmatpush.bf16.msrb.mxu1 %v871_v47 }
  0x41   :  { %v151_v19 = vpack.c.bf16 %v147_v14, %v147_v14  ;;  %v149_v20 = vmul.f32 %v136_v18, %v1066_v9  ;;  %v146_v21 = vsel %vm145_vm12, %v888_v55, %v142_v16  ;;  %v863_v9 = vld [vmem:[%s1144_s3 + $0x8] sm:$0xff]  ;;  %v880_v55 = vld [vmem:[%s1147_s6] ss:$0 sm:$0xff] }
  0x42   :  { %v152_v22 = vpack.c.bf16 %v148_v17, %v148_v17  ;;  %v150_v23 = vmul.f32 %v146_v21, %v1069_v10  ;;  %v862_v10 = vld [vmem:[%s1144_s3] sm:$0xff] }
  0x43   :  { %423 = vmatmul.bf16.vlgmr.msra.gmra.mxu0 %v151_v19  ;;  %v153_v24 = vpack.c.bf16 %v149_v20, %v149_v20 }
  0x44   :  { %436 = vmatmul.bf16.vlgmr.msra.gmra.mxu1 %v152_v22  ;;  %v154_v25 = vpack.c.bf16 %v150_v23, %v150_v23  ;;  %542 = vmatpush.bf16.msrb.mxu0 %v864_v8 }
  0x45   :  { %449 = vmatmul.bf16.vlgmr.msra.gmra.mxu2 %v153_v24  ;;  %627 = vmatpush.bf16.msrb.mxu1 %v870_v48 }
  0x46   :  { %462 = vmatmul.bf16.vlgmr.msra.gmra.mxu3 %v154_v25 }
  0x48   :  { %543 = vmatpush.bf16.msrb.mxu0 %v863_v9 }
  0x4c   :  { %544 = vmatpush.bf16.msrb.mxu0 %v862_v10 }
  0xc0   :  { %v424_v32 = vpop.f32.mrf.mxu0 }
  0xc1   :  { %v425_v33 = vadd.f32 %v878_v30, %v424_v32  ;;  %v437_v34 = vpop.f32.mrf.mxu1 }
  0xc3   :  { %v438_v36 = vadd.f32 %v437_v34, %v425_v33 }
  0xc8   :  { %v450_v37 = vpop.f32.mrf.mxu2  ;;  %v426_v38 = vpop.f32.mrf.mxu0 }
  0xc9   :  { %v451_v39 = vadd.f32 %v450_v37, %v438_v36  ;;  %v463_v40 = vpop.f32.mrf.mxu3  ;;  %v439_v41 = vpop.f32.mrf.mxu1 }
  0xcb   :  { %v464_v42 = vadd.f32 %v463_v40, %v451_v39 }
  0xcd   :  { %v467_v43 = vmax.f32 %v464_v42, 0.0 }
  0xcf   :  { %v468_v44 = vpack.c.bf16 %v467_v43, %v467_v43 }
  0xd0   :  { %v452_v45 = vpop.f32.mrf.mxu2 }
  0xd1   :  { %v465_v46 = vpop.f32.mrf.mxu3  ;;  %545 = vmatmul.bf16.vlgmr.msrb.gmra.mxu0 %v468_v44 }
 0x14e   :  { %v546_v50 = vpop.f32.mrf.mxu0 }
 0x14f   :  { %v547_v51 = vadd.f32 %v879_v49, %v546_v50 }
 0x151   :  { %v550_v52 = vmax.f32 %v547_v51, 0.0 }
 0x153   :  { %v551_v53 = vpack.c.bf16 %v550_v52, %v550_v52 }
 0x155   :  { %628 = vmatmul.bf16.vlgmr.msrb.gmra.mxu1 %v551_v53 }
 0x156   :  { %v548_v54 = vpop.f32.mrf.mxu0 }
 0x1d2   :  { %v629_v56 = vpop.f32.mrf.mxu1 }
 0x1d3   :  { %v630_v57 = vadd.f32 %v880_v55, %v629_v56 }
 0x1d5   :  { %633 = vst [vmem:[%s1148_s7] sm:$0xff] %v630_v57 }
 0x1da   :  { %v631_v58 = vpop.f32.mrf.mxu1 }

</bundles_post_ra>
